<compile_context>
chip_gen: v6e
topology: v6e:2x2x1
jax: 0.10.0
libtpu: 0.0.40
codegen_flags: <defaults>
</compile_context>

<pallas_src>
import functools

import jax
import jax.numpy as jnp
from jax.experimental import pallas as pl
from jax.experimental.pallas import tpu as pltpu

LANES = 128
SUBLANES = 8
NUM_CORES = 2                          # leading "parallel" grid axis (v7x megacore)
TARGET_BLOCK_BYTES = 2 * 1024 * 1024   # ~2 MiB per input block buffer
DEFAULT_MIN_PALLAS_ELEMS = 1 << 18     # below this, fused XLA reduction wins


def _mse_sum_kernel(p_ref, l_ref, o_ref, acc_ref, *,
                    col_tiles, per_core, width, valid_cols):
    """Accumulate sum((p - l)^2) over this core's column tiles.

    p_ref, l_ref : (B, width) input tiles (incoming dtype, upcast in-kernel)
    o_ref        : (8, 128) per-core output block (scalar broadcast)
    acc_ref      : (B, width) f32 VMEM-resident vector accumulator
    """
    c = pl.program_id(0)               # core slice    ("parallel")
    i = pl.program_id(1)               # column tile   ("arbitrary" / reduction)
    j = c * per_core + i               # global column-tile index

    @pl.when(i == 0)
    def _init():
        acc_ref[...] = jnp.zeros_like(acc_ref)

    @pl.when(j < col_tiles)            # skip clamped (out-of-range) steps
    def _accumulate():
        d = p_ref[...].astype(jnp.float32) - l_ref[...].astype(jnp.float32)
        if valid_cols % width != 0:
            # Ragged tail: mask the garbage columns of the last partial tile.
            col = jax.lax.broadcasted_iota(jnp.int32, d.shape, 1)
            d = jnp.where(col < (valid_cols - j * width), d, 0.0)
        # Pure VALU update; no cross-lane reduce / scalar RMW in the loop.
        acc_ref[...] += d * d

    @pl.when(i == pl.num_programs(1) - 1)
    def _finalize():
        # Single cross-lane reduction per core, once, at the end.
        o_ref[...] = jnp.full(o_ref.shape, jnp.sum(acc_ref[...]), jnp.float32)


def loss_forward(prediction, label, reduction="mean", *,
                 target_block_bytes=TARGET_BLOCK_BYTES,
                 min_pallas_elems=DEFAULT_MIN_PALLAS_ELEMS):
    """Pallas equivalent of LossFunction.forward.

    prediction: (B, N, 2); label: pair/stack of two (B, N) arrays.
    Returns a scalar float32 loss (reduction in {'mean', 'sum'}).
    """
    pred = jnp.asarray(prediction)
    lab0 = jnp.asarray(label[0])
    lab1 = jnp.asarray(label[1])
    dtype = jnp.promote_types(jnp.promote_types(pred.dtype, lab0.dtype), lab1.dtype)

    # Keep narrow dtypes (bf16) narrow in HBM; upcast happens inside the kernel.
    pred = pred.astype(dtype)
    # Single interleave copy so label pairs line up with prediction's layout.
    lab = jnp.stack([lab0.astype(dtype), lab1.astype(dtype)], axis=-1)  # (B, N, 2)

    B, N = lab0.shape
    m = B * N                       # elements per MSE term
    two_n = 2 * N
    total = 2 * m

    if reduction == "mean":
        scale = 1.0 / float(m)      # mse0 + mse1 == (sum0 + sum1) / m
    elif reduction == "sum":
        scale = 1.0
    else:
        # TODO(synk): reduction='none' (per-element output) not implemented.
        raise ValueError(f"unsupported reduction: {reduction!r}")

    # Zero-copy, lane-dense views: (B, N, 2) -> (B, 2N) is a contiguous reshape.
    p2d = pred.reshape(B, two_n)
    l2d = lab.reshape(B, two_n)

    def _jnp_fallback():
        d = p2d.astype(jnp.float32) - l2d.astype(jnp.float32)
        return (jnp.sum(d * d) * jnp.float32(scale)).astype(jnp.float32)

    itemsize = jnp.dtype(dtype).itemsize
    rows_phys = ((B + SUBLANES - 1) // SUBLANES) * SUBLANES
    w_max = (target_block_bytes // (rows_phys * itemsize)) // LANES * LANES

    # Small / degenerate problems: pallas_call launch + pipeline overhead dwarfs
    # the work, so use XLA's fused reduction instead.
    if total < min_pallas_elems or two_n < LANES or w_max < LANES:
        return _jnp_fallback()

    width = min(w_max, (two_n // LANES) * LANES)     # 128 <= width <= 2N
    col_tiles = pl.cdiv(two_n, width)
    per_core = pl.cdiv(col_tiles, NUM_CORES)

    def in_index_map(c, i):
        # Clamp so the spare step on the last core stays in bounds; the kernel
        # skips its accumulation via pl.when(j < col_tiles).
        return (0, jnp.minimum(c * per_core + i, col_tiles - 1))

    kernel = functools.partial(_mse_sum_kernel, col_tiles=col_tiles,
                               per_core=per_core, width=width, valid_cols=two_n)

    partials = pl.pallas_call(
        kernel,
        out_shape=jax.ShapeDtypeStruct((NUM_CORES, SUBLANES, LANES), jnp.float32),
        grid_spec=pltpu.PrefetchScalarGridSpec(
            num_scalar_prefetch=0,
            grid=(NUM_CORES, per_core),
            in_specs=[
                pl.BlockSpec((B, width), in_index_map),
                pl.BlockSpec((B, width), in_index_map),
            ],
            out_specs=pl.BlockSpec((None, SUBLANES, LANES), lambda c, i: (c, 0, 0)),
            scratch_shapes=[pltpu.VMEM((B, width), jnp.float32)],
        ),
        compiler_params=pltpu.CompilerParams(
            dimension_semantics=("parallel", "arbitrary")),
    )(p2d, l2d)

    total_sum = jnp.sum(partials[:, 0, 0])           # add the per-core partials
    return (total_sum * jnp.float32(scale)).astype(jnp.float32)


def reference_loss(prediction, label, reduction="mean"):
    red = jnp.mean if reduction == "mean" else jnp.sum
    p = jnp.asarray(prediction, jnp.float32)
    l0 = jnp.asarray(label[0], jnp.float32)
    l1 = jnp.asarray(label[1], jnp.float32)
    return red((p[:, :, 0] - l0) ** 2) + red((p[:, :, 1] - l1) ** 2)


if __name__ == "__main__":
    key = jax.random.PRNGKey(0)
    kp, k0, k1, kq, k2, k3 = jax.random.split(key, 6)

    # Case 1: DeepONet-like shapes (batch=2, 200 output points, 2 components).
    B, N = 2, 200
    prediction = jax.random.normal(kp, (B, N, 2), jnp.float32)
    label = (jax.random.normal(k0, (B, N), jnp.float32),
             jax.random.normal(k1, (B, N), jnp.float32))

    loss = jax.block_until_ready(
        loss_forward(prediction, label, "mean", min_pallas_elems=0))
    ref = reference_loss(prediction, label, "mean")
    assert loss.shape == (), loss.shape
    assert jnp.allclose(loss, ref, rtol=1e-4, atol=1e-5), (loss, ref)

    loss_sum = jax.block_until_ready(
        loss_forward(prediction, label, "sum", min_pallas_elems=0))
    ref_sum = reference_loss(prediction, label, "sum")
    assert jnp.allclose(loss_sum, ref_sum, rtol=1e-4, atol=1e-4), (loss_sum, ref_sum)

    # Case 2: tiny block size to exercise multi-step accumulation per core,
    # the clamped (skipped) grid step, and the ragged-column-tail mask.
    B2, N2 = 4, 3100
    prediction2 = jax.random.normal(kq, (B2, N2, 2), jnp.float32)
    label2 = (jax.random.normal(k2, (B2, N2), jnp.float32),
              jax.random.normal(k3, (B2, N2), jnp.float32))
    loss2 = jax.block_until_ready(
        loss_forward(prediction2, label2, "mean",
                     target_block_bytes=8 * 1024, min_pallas_elems=0))
    ref2 = reference_loss(prediction2, label2, "mean")
    assert jnp.allclose(loss2, ref2, rtol=1e-4, atol=1e-5), (loss2, ref2)

    print("KERNEL_OK")
</pallas_src>

<mosaic_0001>
module attributes {stable_mosaic.version = 11 : i64} {
  func.func @_mse_sum_kernel(%arg0: i32, %arg1: i32, %arg2: memref<2x384xf32, #tpu.memory_space<vmem>>, %arg3: memref<2x384xf32, #tpu.memory_space<vmem>>, %arg4: memref<1x8x128xf32, #tpu.memory_space<vmem>>, %arg5: memref<2x384xf32, #tpu.memory_space<vmem>>) attributes {dimension_semantics = [#tpu.dimension_semantics<parallel>, #tpu.dimension_semantics<arbitrary>], iteration_bounds = array<i64: 2, 1>, scalar_prefetch = 0 : i64, scratch_operands = 1 : i64, tpu.core_type = #tpu.core_type<tc>, window_params = [{transform_indices = @transform_0, window_bounds = array<i64: 2, 384>}, {transform_indices = @transform_1, window_bounds = array<i64: 2, 384>}, {transform_indices = @transform_2, window_bounds = array<i64: 1, 8, 128>}]} {
    %c1_i32 = arith.constant 1 : i32
    %0 = arith.muli %arg0, %c1_i32 : i32
    %1 = arith.addi %0, %arg1 : i32
    %c0_i32 = arith.constant 0 : i32
    %2 = arith.cmpi eq, %arg1, %c0_i32 : i32
    %3 = arith.extui %2 : i1 to i32
    %c0_i32_0 = arith.constant 0 : i32
    %4 = arith.cmpi ne, %3, %c0_i32_0 : i32
    scf.if %4 {
      %cst = arith.constant 0.000000e+00 : f32
      %11 = vector.broadcast %cst : f32 to vector<2x384xf32>
      %c0 = arith.constant 0 : index
      %c0_4 = arith.constant 0 : index
      %12 = vector.load %arg5[%c0, %c0_4] : memref<2x384xf32, #tpu.memory_space<vmem>>, vector<2x384xf32>
      tpu.vector_store %arg5[%c0, %c0_4], %11 {strides = array<i32>} : memref<2x384xf32, #tpu.memory_space<vmem>>, vector<2x384xf32>,
    } else {
    }
    %c2_i32 = arith.constant 2 : i32
    %5 = arith.cmpi slt, %1, %c2_i32 : i32
    %6 = arith.extui %5 : i1 to i32
    %c0_i32_1 = arith.constant 0 : i32
    %7 = arith.cmpi ne, %6, %c0_i32_1 : i32
    scf.if %7 {
      %c0 = arith.constant 0 : index
      %c0_4 = arith.constant 0 : index
      %11 = vector.load %arg2[%c0, %c0_4] : memref<2x384xf32, #tpu.memory_space<vmem>>, vector<2x384xf32>
      %c0_5 = arith.constant 0 : index
      %c0_6 = arith.constant 0 : index
      %12 = vector.load %arg3[%c0_5, %c0_6] : memref<2x384xf32, #tpu.memory_space<vmem>>, vector<2x384xf32>
      %13 = arith.subf %11, %12 : vector<2x384xf32>
      %14 = tpu.iota {dimensions = array<i32: 1>} : vector<2x384xi32>
      %c384_i32 = arith.constant 384 : i32
      %15 = arith.muli %1, %c384_i32 : i32
      %c400_i32 = arith.constant 400 : i32
      %16 = arith.subi %c400_i32, %15 : i32
      %17 = vector.broadcast %16 : i32 to vector<2x384xi32>
      %18 = arith.cmpi slt, %14, %17 : vector<2x384xi32>
      %cst = arith.constant 0.000000e+00 : f32
      %19 = vector.broadcast %cst : f32 to vector<2x384xf32>
      %20 = arith.select %18, %13, %19 : vector<2x384xi1>, vector<2x384xf32>
      %c0_7 = arith.constant 0 : index
      %c0_8 = arith.constant 0 : index
      %21 = vector.load %arg5[%c0_7, %c0_8] : memref<2x384xf32, #tpu.memory_space<vmem>>, vector<2x384xf32>
      %22 = arith.mulf %20, %20 : vector<2x384xf32>
      %23 = arith.addf %21, %22 : vector<2x384xf32>
      %c0_9 = arith.constant 0 : index
      %c0_10 = arith.constant 0 : index
      %24 = vector.load %arg5[%c0_9, %c0_10] : memref<2x384xf32, #tpu.memory_space<vmem>>, vector<2x384xf32>
      tpu.vector_store %arg5[%c0_9, %c0_10], %23 {strides = array<i32>} : memref<2x384xf32, #tpu.memory_space<vmem>>, vector<2x384xf32>,
    } else {
    }
    %c0_i32_2 = arith.constant 0 : i32
    %8 = arith.cmpi eq, %arg1, %c0_i32_2 : i32
    %9 = arith.extui %8 : i1 to i32
    %c0_i32_3 = arith.constant 0 : i32
    %10 = arith.cmpi ne, %9, %c0_i32_3 : i32
    scf.if %10 {
      %c0 = arith.constant 0 : index
      %c0_4 = arith.constant 0 : index
      %11 = vector.load %arg5[%c0, %c0_4] : memref<2x384xf32, #tpu.memory_space<vmem>>, vector<2x384xf32>
      %12 = vector.shape_cast %11 : vector<2x384xf32> to vector<1x2x384xf32>
      %cst = arith.constant dense<0.000000e+00> : vector<1xf32>
      %13 = vector.multi_reduction <add>, %12, %cst [1, 2] : vector<1x2x384xf32> to vector<1xf32>
      %14 = vector.shape_cast %13 : vector<1xf32> to vector<1x1x1xf32>
      %15 = vector.extract %14[0, 0, 0] : f32 from vector<1x1x1xf32>
      %16 = vector.broadcast %15 : f32 to vector<8x128xf32>
      %c0_5 = arith.constant 0 : index
      %c0_6 = arith.constant 0 : index
      %c0_7 = arith.constant 0 : index
      %17 = vector.load %arg4[%c0_5, %c0_6, %c0_7] : memref<1x8x128xf32, #tpu.memory_space<vmem>>, vector<1x8x128xf32>
      %18 = vector.shape_cast %17 : vector<1x8x128xf32> to vector<8x128xf32>
      %19 = vector.shape_cast %16 : vector<8x128xf32> to vector<1x8x128xf32>
      tpu.vector_store %arg4[%c0_5, %c0_6, %c0_7], %19 {strides = array<i32>} : memref<1x8x128xf32, #tpu.memory_space<vmem>>, vector<1x8x128xf32>,
    } else {
    }
    return
  }
  func.func @transform_0(%arg0: i32, %arg1: i32) -> (i32, i32) {
    %c1_i32 = arith.constant 1 : i32
    %0 = arith.muli %arg0, %c1_i32 : i32
    %1 = arith.addi %0, %arg1 : i32
    %c1_i32_0 = arith.constant 1 : i32
    %2 = arith.minsi %1, %c1_i32_0 : i32
    %c0_i32 = arith.constant 0 : i32
    %c0_i32_1 = arith.constant 0 : i32
    return %c0_i32, %2 : i32, i32
  }
  func.func @transform_1(%arg0: i32, %arg1: i32) -> (i32, i32) {
    %c1_i32 = arith.constant 1 : i32
    %0 = arith.muli %arg0, %c1_i32 : i32
    %1 = arith.addi %0, %arg1 : i32
    %c1_i32_0 = arith.constant 1 : i32
    %2 = arith.minsi %1, %c1_i32_0 : i32
    %c0_i32 = arith.constant 0 : i32
    %c0_i32_1 = arith.constant 0 : i32
    return %c0_i32, %2 : i32, i32
  }
  func.func @transform_2(%arg0: i32, %arg1: i32) -> (i32, i32, i32) {
    %c0_i32 = arith.constant 0 : i32
    %c0_i32_0 = arith.constant 0 : i32
    %c0_i32_1 = arith.constant 0 : i32
    return %arg0, %c0_i32, %c0_i32_0 : i32, i32, i32
  }
}

</mosaic_0001>

<bundles_post_ra>
// kernel: tpu_custom_call.1
= control target key start
LH: loop header
LB: loop body
LE: loop exit
PB: predicated region body
PF: predicated region fallthrough
CT: control target
= control target key end

     0   :  { %7 = vsyncpa [#allocation4], 0  ;;  %s1007_s0 = inlined_call_operand.hbm [shape: f32[2,400], index: 0, kind: input, shape index: {}]   ;;  %s1008_s1 = inlined_call_operand.hbm [shape: f32[2,400], index: 1, kind: input, shape index: {}]   ;;  %s1009_s2 = inlined_call_operand.hbm [shape: f32[2,8,128], index: 2, kind: output, shape index: {}]  }
   0x1   :  { %9 = vsyncpa [#allocation4 + $0x1], 0 }
   0x2   :  { %10 = vsyncpa [#allocation7], 0 }
   0x3   :  { %12 = vsyncpa [#allocation7 + $0x1], 0 }
   0x4   :  { %13 = vsyncpa [#allocation5], 0 }
   0x5   :  { %15 = vsyncpa [#allocation5 + $0x1], 0  ;;  %s780_s9 = smov 0   ;;  %s782_s10 = smov 0  }
   0x6   :  { %s784_s11 = smov 0   ;;  %s786_s12 = smov 0  }
   0x7   :  { %s788_s13 = smov 0   ;;  %s790_s14 = smov 0  }
   0x8   :  { %s792_s15 = smov 0   ;;  %s794_s16 = smov 0  }
   0x9   :  { %s796_s17 = smov 0  }
   0xa LB: > { %s484_s18 = sadd.s32 4294967295, %s757_s17   ;;  %s485_s19 = sadd.s32 4294967294, %s757_s17   ;;  %s757_s17 = sphi %s796_s17, %s21_s17   ;;  %s753_s16 = sphi %s794_s16, %s1024_s16   ;;  %s749_s15 = sphi %s792_s15, %s1023_s15   ;;  %s745_s14 = sphi %s790_s14, %s1022_s14   ;;  %s741_s13 = sphi %s788_s13, %s1021_s13   ;;  %s737_s12 = sphi %s786_s12, %s1020_s12   ;;  %s733_s11 = sphi %s784_s11, %s1019_s11   ;;  %s729_s10 = sphi %s782_s10, %s1018_s10   ;;  %s725_s9 = sphi %s780_s9, %s1017_s9  }
   0xb   : > { %s33_s20 = sadd.s32 1, %s753_s16  ;;  %p38_p0 = scmp.lt.s32.totalorder %s753_s16, 1 }
   0xc   : > { %p35_p1 = scmp.ge.s32.totalorder %s33_s20, 2  ;;  %s46_s21 = sadd.s32 1, %s745_s14 }
   0xd   : > { %s829_s22 = scalar_select %p38_p0, %s753_s16, 1 }
   0xe   : > { %s1026_s20 = smov (%p35_p1, %s33_s20), 0  ;;  %p53_p2 = scmp.ne.s32.totalorder %s745_s14, %s741_s13 }
   0xf   : > { %p54_p3 = scmp.eq.s32.totalorder %s757_s17, 0  ;;  %p41_p4 = scmp.lt.s32.totalorder %s1026_s20, 1 }
  0x10   : > { %p59_p5 = scmp.ne.s32.totalorder %s741_s13, %s737_s12  ;;  %p60_p7 = scmp.eq.s32.totalorder %s484_s18, 0 }
  0x11   : > { %p838_p6 = por %p54_p3, %p53_p2  ;;  %s101_s26 = ssub.s32 %s753_s16, %s1026_s20 }
  0x12   : > { %s42_s24 = scalar_select %p41_p4, %s1026_s20, 1 }
  0x13   : > { %p843_p8 = por %p60_p7, %p59_p5  ;;  %p102_p9 = scmp.eq.s32.totalorder %s101_s26, 0 }
  0x14   : > { %s43_s27 = ssub.s32 %s829_s22, %s42_s24  ;;  %s104_s28 = sadd.s32 1, %s733_s11 }
  0x15   : > { %p44_p10 = scmp.eq.s32.totalorder %s43_s27, 0  ;;  %p114_p11 = scmp.ne.s32.totalorder %s733_s11, %s729_s10 }
  0x16   : > { %s852_s29 = scalar_select %p102_p9, %s733_s11, %s104_s28  }
  0x17   : > { %s855_s30 = scalar_select %p44_p10, %s745_s14, %s46_s21  }
  0x18   : > { %p115_p12 = scmp.eq.s32.totalorder %s484_s18, 1  ;;  %p120_p13 = scmp.ne.s32.totalorder %s729_s10, %s725_s9 }
  0x19   : > { %p121_p0 = scmp.eq.s32.totalorder %s485_s19, 1  ;;  %p1010_p3 = scmp.ge.s32.totalorder %s757_s17, 2 }
  0x1a   : > { %p861_p1 = por %p115_p12, %p114_p11 }
  0x1b   : > { %p865_p2 = por %p121_p0, %p120_p13  ;;  %137 = sbr.rel (%p1010_p3) target bundleno = 98 (0x62), region = 16 }
  0x1d   : > { %s1014_s4 = scalar_select %p865_p2, 1, 0 }
  0x20   : > { %140 = sbr.rel (!%p838_p6) target bundleno = 65 (0x41), region = 20  ;;  %s141_s5 = sand.u32 (%p838_p6), 1, %s745_s14  }
  0x21   : > { %s149_s6 = smul.u32 (%p838_p6), 3, %s829_s22  ;;  %s879_s19 = scalar_lea.sflag (%p838_p6), [#allocation4], %s141_s5 }
  0x22   : > { %s507_s7 = smul.u32 (%p838_p6), 6, %s141_s5 }
  0x23   : > { %s150_s8 = ssub.s32 (%p838_p6), 4, %s149_s6 }
  0x24   : > { %p151_p4 = scmp.lt.s32.totalorder (%p838_p6), %s150_s8, 3  ;;  %s145_s21 = scalar_lea.vmem (%p838_p6), [#allocation3], %s507_s7 }
  0x26   : > { %s1028_s8 = smov (!%p151_p4, %s150_s8), 3 }
  0x27   : > { %s876_s12 = sshll.u32 %s1028_s8, 5 }
  0x28   : > { %s155_s18 = ssub.s32 96, %s876_s12 }
  0x29   : > { %156 = vsyncadd %s879_s19, %s155_s18  ;;  %p489_p5 = scmp.ne.s32.totalorder %s876_s12, 0  ;;  %s505_s24 = smul.u32 96, %s829_s22 }
  0x2a   : > { %s162_s26 = sshll.u32 %s145_s21, 4  ;;  %s601_s18 = scalar_lea.hbm %s1007_s0, 128  ;;  %s163_s26 = int_to_ptr.vmem [resolvable:$true] %s162_s26 }
  0x2b   : > { %s159_s6 = scalar_lea.hbm %s1007_s0, %s505_s24 }
  0x2c   : > { %s597_s8 = scalar_lea.hbm %s159_s6, %s876_s12 }
  0x2d   : > { %p598_p7 = scmp.ne.s32.totalorder %s159_s6, %s597_s8  ;;  %p603_p11 = scmp.lt.s32.totalorder %s601_s18, %s597_s8 }
  0x2f   : > { %p599_p9 = pnand %p598_p7, %p489_p5 }
  0x31   : > { %p600_p10 = pneg %p599_p9 }
  0x33   : > { %p605_p12 = pnand %p603_p11, %p600_p10 }
  0x35   : > { %608 = shalt.err (!%p605_p12)
}
  0x36   : > { %s609_s21 = scalar_lea.vmem %s163_s26, %s876_s12  ;;  %s759_s24 = smov [#allocation3]  }
  0x37   : > { %p610_p13 = scmp.ne.s32.totalorder %s163_s26, %s609_s21  ;;  %s613_s27 = sshll.u32 %s759_s24, 4  ;;  %s614_s27 = int_to_ptr.vmem [resolvable:$false] %s613_s27 }
  0x38   : > { %s615_s28 = scalar_lea.vmem %s614_s27, 192  ;;  %p616_p7 = scmp.lt.s32.totalorder %s163_s26, %s614_s27 }
  0x39   : > { %p611_p0 = pnand %p610_p13, %p489_p5  ;;  %p617_p9 = scmp.lt.s32.totalorder %s615_s28, %s609_s21 }
  0x3b   : > { %p612_p4 = pneg %p611_p0  ;;  %p618_p3 = por %p617_p9, %p616_p7 }
  0x3d   : > { %p619_p2 = pnand %p618_p3, %p612_p4 }
  0x3f   : > { %622 = shalt.err (!%p619_p2)
}
  0x40   : > { %165 = dma.hbm_to_vmem [thread:$0]  (%p489_p5), %s159_s6, %s876_s12, %s163_s26, %s879_s19  }
  0x41 PF: > { %168 = sbr.rel (!%p838_p6) target bundleno = 98 (0x62), region = 24  ;;  %s169_s8 = sand.u32 (%p838_p6), 1, %s745_s14  }
  0x42   : > { %s177_s5 = smul.u32 (%p838_p6), 3, %s829_s22  ;;  %s907_s27 = scalar_lea.sflag (%p838_p6), [#allocation7], %s169_s8 }
  0x43   : > { %s508_s7 = smul.u32 (%p838_p6), 6, %s169_s8 }
  0x44   : > { %s178_s18 = ssub.s32 (%p838_p6), 4, %s177_s5 }
  0x45   : > { %p179_p10 = scmp.lt.s32.totalorder (%p838_p6), %s178_s18, 3  ;;  %s173_s12 = scalar_lea.vmem (%p838_p6), [#allocation6], %s508_s7 }
  0x47   : > { %s1030_s18 = smov (!%p179_p10, %s178_s18), 3 }
  0x48   : > { %s904_s21 = sshll.u32 %s1030_s18, 5 }
  0x49   : > { %s183_s24 = ssub.s32 96, %s904_s21 }
  0x4a   : > { %184 = vsyncadd %s907_s27, %s183_s24  ;;  %p494_p6 = scmp.ne.s32.totalorder %s904_s21, 0  ;;  %s506_s23 = smul.u32 96, %s829_s22 }
  0x4b   : > { %s190_s19 = sshll.u32 %s173_s12, 4  ;;  %s627_s18 = scalar_lea.hbm %s1008_s1, 128  ;;  %s191_s19 = int_to_ptr.vmem [resolvable:$true] %s190_s19 }
  0x4c   : > { %s187_s28 = scalar_lea.hbm %s1008_s1, %s506_s23 }
  0x4d   : > { %s623_s5 = scalar_lea.hbm %s187_s28, %s904_s21 }
  0x4e   : > { %p624_p2 = scmp.ne.s32.totalorder %s187_s28, %s623_s5  ;;  %p629_p11 = scmp.lt.s32.totalorder %s627_s18, %s623_s5 }
  0x50   : > { %p625_p3 = pnand %p624_p2, %p494_p6 }
  0x52   : > { %p626_p5 = pneg %p625_p3 }
  0x54   : > { %p631_p12 = pnand %p629_p11, %p626_p5 }
  0x56   : > { %634 = shalt.err (!%p631_p12)
}
  0x57   : > { %s635_s22 = scalar_lea.vmem %s191_s19, %s904_s21  ;;  %s760_s24 = smov [#allocation6]  }
  0x58   : > { %p636_p13 = scmp.ne.s32.totalorder %s191_s19, %s635_s22  ;;  %s639_s12 = sshll.u32 %s760_s24, 4  ;;  %s640_s12 = int_to_ptr.vmem [resolvable:$false] %s639_s12 }
  0x59   : > { %s641_s23 = scalar_lea.vmem %s640_s12, 192  ;;  %p642_p7 = scmp.lt.s32.totalorder %s191_s19, %s640_s12 }
  0x5a   : > { %p637_p0 = pnand %p636_p13, %p494_p6  ;;  %p643_p9 = scmp.lt.s32.totalorder %s641_s23, %s635_s22 }
  0x5c   : > { %p638_p4 = pneg %p637_p0  ;;  %p644_p10 = por %p643_p9, %p642_p7 }
  0x5e   : > { %p645_p2 = pnand %p644_p10, %p638_p4 }
  0x60   : > { %648 = shalt.err (!%p645_p2)
}
  0x61   : > { %193 = dma.hbm_to_vmem [thread:$0]  (%p494_p6), %s187_s28, %s904_s21, %s191_s19, %s907_s27  }
  0x62 PF: > { %p498_p3 = scmp.ge.s32.totalorder %s757_s17, 1  ;;  %p195_p5 = scmp.lt.s32.totalorder %s757_s17, 3 }
  0x64   : > { %p196_p11 = pnand %p498_p3, %p195_p5 }
  0x65   : > { %s201_s26 = sand.u32 (!%p196_p11), 1, %s741_s13  }
  0x66   : > { %199 = sbr.rel (%p196_p11) target bundleno = 370 (0x172), region = 28  ;;  %s202_s5 = scalar_lea.sflag (!%p196_p11), [#allocation4], %s201_s26 }
  0x67   : > { %s509_s6 = smul.u32 (!%p196_p11), 6, %s201_s26 }
  0x69   : > { %s205_s8 = scalar_lea.vmem (!%p196_p11), [#allocation3], %s509_s6 }
  0x6b   : > { %712 = dma.done.wait (%p843_p8), %s202_s5, 96  }
  0x6c   : > { %714 = vsyncadd (%p843_p8), %s202_s5, 4294967200  ;;  %s211_s21 = scalar_lea.sflag [#allocation7], %s201_s26  ;;  %s214_s27 = scalar_lea.vmem [#allocation6], %s509_s6 }
  0x6d   : > { %716 = dma.done.wait (%p843_p8), %s211_s21, 96  }
  0x6e   : > { %718 = vsyncadd (%p843_p8), %s211_s21, 4294967200  ;;  %s237_s19 = sand.u32 1, %s729_s10   ;;  %v761_v0 = vmov 0.0   ;;  %p500_p6 = scmp.ge.s32.totalorder %s749_s15, 2 }
  0x6f   : > { %s942_s28 = sshll.u32 %s237_s19, 3  ;;  %261 = vst [vmem:[#allocation2] sm:$0x3f] %v761_v0  ;;  %s273_s18 = smul.u32 (!%p500_p6), 384, %s749_s15 }
  0x70   : > { %s239_s7 = scalar_lea.vmem [#allocation8], %s942_s28  ;;  %265 = sbr.rel (%p500_p6) target bundleno = 140 (0x8c), region = 44 }
  0x71   : > { %s274_s25 = ssub.s32 (!%p500_p6), 400, %s273_s18 }
  0x75   : > { %v266_v1 = vld [vmem:[%s205_s8] sm:$0x3f]  ;;  %v267_v2 = vld [vmem:[%s214_s27] sm:$0x3f]  ;;  %v269_v3 = vlaneseq  ;;  %v762_v6 = vmov 1983009808   ;;  %v275_v10 = vstv %s274_s25 }
  0x76   : > { %v268_v4 = vsub.f32 %v266_v1, %v267_v2  ;;  %v282_v7 = vunpack.c.l.s4 %v762_v6  ;;  %v302_v27 = vld [vmem:[#allocation2] sm:$0x3f] }
  0x77   : > { %v270_v5 = vand.u32 127, %v269_v3  ;;  %v285_v8 = vshrl.u32 %v269_v3, 7 }
  0x78   : > { %v280_v11 = vcombine.high %v268_v4, %v268_v4  ;;  %v283_v12 = vunpack.c.0.s8 %v282_v7 }
  0x79   : > { %v272_v9 = vadd.s32 256, %v270_v5  ;;  %v271_v13 = vadd.s32 128, %v270_v5  ;;  %vm276_vm0 = vcmp.lt.s32.totalorder %v270_v5, %v275_v10 }
  0x7a   : > { %v286_v14 = vsub.s32 %v283_v12, %v285_v8 }
  0x7b   : > { %vm278_vm1 = vcmp.lt.s32.totalorder %v272_v9, %v275_v10  ;;  %vm277_vm2 = vcmp.lt.s32.totalorder %v271_v13, %v275_v10 }
  0x7c   : > { %v287_v15 = vrot.slane %v268_v4, %v286_v14  ;;  %v294_v16 = vrot.slane %v280_v11, %v286_v14 }
  0x7e   : > { %v295_v17 = vcombine.high %v287_v15, %v287_v15  ;;  %v299_v18 = vsel %vm276_vm0, %v287_v15, 0.0  ;;  %v301_v19 = vsel %vm278_vm1, %v294_v16, 0.0 }
  0x7f   : > { %v303_v20 = vmul.f32 %v299_v18, %v299_v18  ;;  %v305_v21 = vmul.f32 %v301_v19, %v301_v19 }
  0x80   : > { %v300_v22 = vsel %vm277_vm2, %v295_v17, 0.0 }
  0x81   : > { %v304_v23 = vmul.f32 %v300_v22, %v300_v22  ;;  %v323_v25 = vrot.slane %v305_v21, %v286_v14 }
  0x83   : > { %v309_v24 = vcombine.low %v303_v20, %v304_v23 }
  0x85   : > { %v316_v26 = vrot.slane %v309_v24, %v286_v14 }
  0x87   : > { %v324_v28 = vcombine.low %v316_v26, %v323_v25 }
  0x89   : > { %v326_v29 = vadd.f32 %v324_v28, %v302_v27 }
  0x8b   : > { %327 = vst [vmem:[#allocation2] sm:$0x3f] %v326_v29 }
  0x8c PF: > { %v337_v30 = vlaneseq  ;;  %v763_v31 = vmov 1983009808   ;;  %vm352_vm3 = vcmask 1041408   ;;  %s502_s22 = sshll.u32 %s749_s15, 7  ;;  %s383_s24 = sshll.u32 %s239_s7, 4  ;;  %s384_s24 = int_to_ptr.vmem [resolvable:$true] %s383_s24 }
  0x8d   : > { %v335_v32 = vunpack.c.l.s4 %v763_v31  ;;  %s953_s26 = scalar_lea.hbm %s1009_s2, %s502_s22  ;;  %s370_s5 = scalar_lea.sflag [#allocation5], %s237_s19 }
  0x8e   : > { %v338_v34 = vshrl.u32 %v337_v30, 7  ;;  %s649_s8 = scalar_lea.vmem %s384_s24, 128  ;;  %s764_s15 = smov [#allocation8]  }
  0x8f   : > { %v336_v36 = vunpack.c.0.s8 %v335_v32  ;;  %p650_p8 = scmp.ne.s32.totalorder %s384_s24, %s649_s8  ;;  %s653_s21 = sshll.u32 %s764_s15, 4  ;;  %s654_s21 = int_to_ptr.vmem [resolvable:$false] %s653_s21 }
  0x90   : > { %s655_s27 = scalar_lea.vmem %s654_s21, 256  ;;  %p656_p0 = scmp.lt.s32.totalorder %s384_s24, %s654_s21 }
  0x91   : > { %v339_v37 = vsub.s32 %v336_v36, %v338_v34  ;;  %p651_p12 = pnand %p650_p8, %p861_p1  ;;  %p657_p4 = scmp.lt.s32.totalorder %s655_s27, %s649_s8 }
  0x92   : > { %v331_v33 = vld [vmem:[#allocation2] sm:$0x3f] }
  0x93   : > { %v333_v35 = vcombine.high %v331_v33, %v331_v33  ;;  %v340_v38 = vrot.slane %v331_v33, %v339_v37  ;;  %p652_p13 = pneg %p651_p12  ;;  %p658_p7 = por %p657_p4, %p656_p0 }
  0x95   : > { %v347_v39 = vrot.slane %v333_v35, %v339_v37  ;;  %v348_v40 = vcombine.high %v340_v38, %v340_v38  ;;  %v353_v41 = vsel %vm352_vm3, %v340_v38, 0.0  ;;  %p659_p9 = pnand %p658_p7, %p652_p13 }
  0x97   : > { %v354_v42 = vsel %vm352_vm3, %v348_v40, 0.0  ;;  %v356_v43 = vsel %vm352_vm3, %v347_v39, 0.0 }
  0x98   : > { %v355_v44 = vadd.f32 %v354_v42, %v353_v41 }
  0x9a   : > { %v357_v45 = vadd.f32 %v356_v43, %v355_v44 }
  0x9c   : > { %358 = vadd.xlane.f32.xlu0 %v357_v45 }
 0x125   : > { %v359_v46 = vpop.xlane.xlu0 %358 }
 0x126   : > { %v360_v47 = vrot.slane %v359_v46, 4 }
 0x128   : > { %v361_v48 = vadd.f32 %v360_v47, %v359_v46 }
 0x12a   : > { %v362_v49 = vrot.slane %v361_v48, 2 }
 0x12c   : > { %v363_v50 = vadd.f32 %v362_v49, %v361_v48 }
 0x12e   : > { %v364_v51 = vrot.slane %v363_v50, 1 }
 0x130   : > { %v365_v52 = vadd.f32 %v364_v51, %v363_v50 }
 0x132   : > { %510 = vpush %v365_v52 }
 0x163   : > { %s511_s6 = spop %510 }
 0x164   : > { %v367_v53 = vstv %s511_s6 }
 0x165   : > { %368 = vst [vmem:[%s239_s7] sm:$0xff] %v367_v53 }
 0x166   : > { %662 = shalt.err (!%p659_p9)
}
 0x167   : > { %s663_s28 = scalar_lea.hbm %s953_s26, 128  ;;  %s667_s18 = scalar_lea.hbm %s1009_s2, 256 }
 0x168   : > { %p664_p10 = scmp.ne.s32.totalorder %s953_s26, %s663_s28  ;;  %p668_p5 = scmp.lt.s32.totalorder %s953_s26, %s1009_s2 }
 0x169   : > { %p669_p11 = scmp.lt.s32.totalorder %s667_s18, %s663_s28 }
 0x16a   : > { %p665_p2 = pnand %p664_p10, %p861_p1 }
 0x16b   : > { %p670_p6 = por %p669_p11, %p668_p5 }
 0x16c   : > { %p666_p3 = pneg %p665_p2 }
 0x16e   : > { %p671_p8 = pnand %p670_p6, %p666_p3 }
 0x170   : > { %674 = shalt.err (!%p671_p8)
}
 0x171   : > { %514 = dma.vmem_to_hbm [thread:$0]  (%p861_p1), %s384_s24, 128, %s953_s26, %s370_s5  }
 0x172 PF: > { %s395_s12 = sand.u32 1, %s725_s9   ;;  %p1015_p12 = scmp.ne.s32.totalorder %s1014_s4, 0 }
 0x173   : > { %p1016_p13 = scmp.ge.s32.totalorder %s757_s17, 2  ;;  %s396_s23 = scalar_lea.sflag [#allocation5], %s395_s12 }
 0x175   : > { %p517_p0 = pnand %p1016_p13, %p1015_p12 }
 0x177   : > { %p518_p4 = pneg %p517_p0 }
 0x179   : > { %720 = dma.done.wait (%p518_p4), %s396_s23, 128  }
 0x17a   : > { %722 = vsyncadd (%p518_p4), %s396_s23, 4294967168  ;;  %s21_s17 = sadd.s32 1, %s757_s17   ;;  %s1017_s9 = smov %s729_s10 }
 0x17b   : > { %p18_p7 = scmp.ge.s32.totalorder %s21_s17, 4   ;;  %s1018_s10 = smov %s733_s11 }
 0x17c   : > { %s1019_s11 = smov %s852_s29  ;;  %s1020_s12 = smov %s741_s13 }
 0x17d   : > { %s1021_s13 = smov %s745_s14  ;;  %s1022_s14 = smov %s855_s30 }
 0x17e   : > { %s1023_s15 = smov %s753_s16  ;;  %s1024_s16 = smov %s1026_s20 }
 0x17f   :  { %20 = sbr.rel (!%p18_p7) target bundleno = 10 (0xa), region = 98 }
 0x184   :  { %401 = vsyncpa [#allocation4], 1 }
 0x185   :  { %403 = vsyncpa [#allocation4 + $0x1], 1 }
 0x186   :  { %404 = vsyncpa [#allocation7], 1 }
 0x187   :  { %406 = vsyncpa [#allocation7 + $0x1], 1 }
 0x188   :  { %407 = vsyncpa [#allocation5], 1 }
 0x189   :  { %409 = vsyncpa [#allocation5 + $0x1], 1 }

</bundles_post_ra>
